<compile_context>
chip_gen: v7x
topology: tpu7x:2x2x1
jax: 0.10.0
libtpu: 0.0.40
codegen_flags: <defaults>
</compile_context>

<pallas_src>
import functools

import jax
import jax.numpy as jnp
from jax.experimental import pallas as pl
from jax.experimental.pallas import tpu as pltpu


def _dwconv_kernel(x_ref, w_ref, b_ref, o_ref, *, H, W, C):
    """Depthwise 3x3 conv (stride 1, pad 1) + bias on one image.

    x_ref: (1, H, W*C)  image, row-major, channels fastest (lane-dense)
    w_ref: (9, W*C)     tap (i, j) -> row i*3+j, per-channel weight tiled over W
    b_ref: (1, W*C)     bias tiled over W
    o_ref: (1, H, W*C)
    """
    WC = W * C
    x = x_ref[0].astype(jnp.float32)                     # (H, WC)
    w = w_ref[...]                                       # (9, WC)
    zrow = jnp.zeros((1, WC), jnp.float32)
    zcol = jnp.zeros((H, C), jnp.float32)

    # Row-shifted copies: rows[i][h, :] == x[h + i - 1, :] (zero outside image).
    rows = (
        jnp.concatenate([zrow, x[:H - 1, :]], axis=0),   # x[h-1, :]
        x,                                               # x[h,   :]
        jnp.concatenate([x[1:, :], zrow], axis=0),       # x[h+1, :]
    )

    acc = jnp.zeros((H, WC), jnp.float32)
    for i in range(3):
        r = rows[i]
        # Column shifts are +-C lane shifts in the flattened (w, c) axis.
        left = jnp.concatenate([zcol, r[:, :WC - C]], axis=1)    # x[., w-1]
        right = jnp.concatenate([r[:, C:], zcol], axis=1)        # x[., w+1]
        acc = acc + left * w[i * 3 + 0:i * 3 + 1, :]
        acc = acc + r * w[i * 3 + 1:i * 3 + 2, :]
        acc = acc + right * w[i * 3 + 2:i * 3 + 3, :]

    o_ref[0] = (acc + b_ref[...]).astype(o_ref.dtype)


def dwconv(x, H, W, w_dw, b_dw):
    """Pallas DWConv forward.

    x: (B, N, C) with N == H*W, raster-order tokens.
    w_dw: (C, 3, 3) depthwise kernel (PyTorch Conv2d weight (C, 1, 3, 3) squeezed).
    b_dw: (C,) bias.
    Returns (B, N, C), same dtype as x.
    """
    B, N, C = x.shape
    assert N == H * W
    WC = W * C

    # Free view: each image row is one contiguous (W*C,) lane vector.
    x_rows = x.reshape(B, H, WC)

    # One-time parameter prep (tiny): tile per-channel taps / bias across W so
    # the in-kernel multiply is a plain broadcast along lanes.
    w_flat = jnp.tile(
        jnp.transpose(w_dw, (1, 2, 0)).reshape(3, 3, 1, C), (1, 1, W, 1)
    ).reshape(9, WC).astype(jnp.float32)
    b_flat = jnp.tile(b_dw.reshape(1, C), (1, W)).astype(jnp.float32)   # (1, WC)

    out = pl.pallas_call(
        functools.partial(_dwconv_kernel, H=H, W=W, C=C),
        out_shape=jax.ShapeDtypeStruct((B, H, WC), x.dtype),
        grid_spec=pltpu.PrefetchScalarGridSpec(
            num_scalar_prefetch=0,
            grid=(B,),
            in_specs=[
                pl.BlockSpec((1, H, WC), lambda b: (b, 0, 0)),
                pl.BlockSpec((9, WC), lambda b: (0, 0)),
                pl.BlockSpec((1, WC), lambda b: (0, 0)),
            ],
            out_specs=pl.BlockSpec((1, H, WC), lambda b: (b, 0, 0)),
        ),
        compiler_params=pltpu.CompilerParams(
            dimension_semantics=("parallel",),
        ),
        # TODO(synk): at production SegFormer shapes (H=W=128, C=64) add an
        # H-row-tile grid axis (with 1-row halos) and set vmem_limit_bytes so
        # the per-step working set stays within v7x's 64 MiB VMEM.
    )(x_rows, w_flat, b_flat)

    return out.reshape(B, N, C)


# ------------------------------ plain-JAX ref ------------------------------ #

def reference(x, H, W, w_dw, b_dw):
    B, N, C = x.shape
    x_nchw = x.transpose(0, 2, 1).reshape(B, C, H, W)
    y = jax.lax.conv_general_dilated(
        x_nchw,
        w_dw.reshape(C, 1, 3, 3),
        window_strides=(1, 1),
        padding=((1, 1), (1, 1)),
        dimension_numbers=("NCHW", "OIHW", "NCHW"),
        feature_group_count=C,
    ) + b_dw[None, :, None, None]
    return y.reshape(B, C, N).transpose(0, 2, 1)


if __name__ == "__main__":
    B, C, H, W = 2, 32, 16, 16
    N = H * W

    key = jax.random.PRNGKey(0)
    kx, kw, kb = jax.random.split(key, 3)
    x = jax.random.normal(kx, (B, N, C), dtype=jnp.float32)
    w_dw = (jax.random.normal(kw, (C, 3, 3), dtype=jnp.float32)
            * (2.0 / (3 * 3)) ** 0.5)
    b_dw = jax.random.normal(kb, (C,), dtype=jnp.float32) * 0.02

    out = dwconv(x, H, W, w_dw, b_dw)
    out = jax.block_until_ready(out)

    out_ref = reference(x, H, W, w_dw, b_dw)
    assert out.shape == (B, N, C)
    assert jnp.allclose(out, out_ref, atol=1e-4, rtol=1e-4), (
        float(jnp.max(jnp.abs(out - out_ref))))

    print("KERNEL_OK")
</pallas_src>

<mosaic_0001>
module attributes {stable_mosaic.version = 11 : i64} {
  func.func @_dwconv_kernel(%arg0: i32, %arg1: memref<1x16x512xf32, #tpu.memory_space<vmem>>, %arg2: memref<9x512xf32, #tpu.memory_space<vmem>>, %arg3: memref<1x512xf32, #tpu.memory_space<vmem>>, %arg4: memref<1x16x512xf32, #tpu.memory_space<vmem>>) attributes {dimension_semantics = [#tpu.dimension_semantics<parallel>], iteration_bounds = array<i64: 2>, scalar_prefetch = 0 : i64, scratch_operands = 0 : i64, tpu.core_type = #tpu.core_type<tc>, window_params = [{transform_indices = @transform_0, window_bounds = array<i64: 1, 16, 512>}, {pipeline_mode = #tpu.pipeline_mode<synchronous>, transform_indices = @transform_1, window_bounds = array<i64: 9, 512>}, {pipeline_mode = #tpu.pipeline_mode<synchronous>, transform_indices = @transform_2, window_bounds = array<i64: 1, 512>}, {transform_indices = @transform_3, window_bounds = array<i64: 1, 16, 512>}]} {
    %c0 = arith.constant 0 : index
    %c0_0 = arith.constant 0 : index
    %c0_1 = arith.constant 0 : index
    %0 = vector.load %arg1[%c0, %c0_0, %c0_1] : memref<1x16x512xf32, #tpu.memory_space<vmem>>, vector<1x16x512xf32>
    %1 = vector.shape_cast %0 : vector<1x16x512xf32> to vector<16x512xf32>
    %c0_2 = arith.constant 0 : index
    %c0_3 = arith.constant 0 : index
    %2 = vector.load %arg2[%c0_2, %c0_3] : memref<9x512xf32, #tpu.memory_space<vmem>>, vector<9x512xf32>
    %cst = arith.constant 0.000000e+00 : f32
    %3 = vector.broadcast %cst : f32 to vector<1x512xf32>
    %cst_4 = arith.constant 0.000000e+00 : f32
    %4 = vector.broadcast %cst_4 : f32 to vector<16x32xf32>
    %5 = vector.extract_strided_slice %1 {offsets = [0, 0], sizes = [15, 512], strides = [1, 1]} : vector<16x512xf32> to vector<15x512xf32>
    %6 = tpu.concatenate %3, %5 in 0 : vector<1x512xf32>, vector<15x512xf32> -> vector<16x512xf32>
    %7 = vector.extract_strided_slice %1 {offsets = [1, 0], sizes = [15, 512], strides = [1, 1]} : vector<16x512xf32> to vector<15x512xf32>
    %8 = tpu.concatenate %7, %3 in 0 : vector<15x512xf32>, vector<1x512xf32> -> vector<16x512xf32>
    %cst_5 = arith.constant 0.000000e+00 : f32
    %9 = vector.broadcast %cst_5 : f32 to vector<16x512xf32>
    %10 = vector.extract_strided_slice %6 {offsets = [0, 0], sizes = [16, 480], strides = [1, 1]} : vector<16x512xf32> to vector<16x480xf32>
    %11 = tpu.concatenate %4, %10 in 1 : vector<16x32xf32>, vector<16x480xf32> -> vector<16x512xf32>
    %12 = vector.extract_strided_slice %6 {offsets = [0, 32], sizes = [16, 480], strides = [1, 1]} : vector<16x512xf32> to vector<16x480xf32>
    %13 = tpu.concatenate %12, %4 in 1 : vector<16x480xf32>, vector<16x32xf32> -> vector<16x512xf32>
    %14 = vector.extract_strided_slice %2 {offsets = [0, 0], sizes = [1, 512], strides = [1, 1]} : vector<9x512xf32> to vector<1x512xf32>
    %15 = vector.broadcast %14 : vector<1x512xf32> to vector<16x512xf32>
    %16 = arith.mulf %11, %15 : vector<16x512xf32>
    %17 = arith.addf %9, %16 : vector<16x512xf32>
    %18 = vector.extract_strided_slice %2 {offsets = [1, 0], sizes = [1, 512], strides = [1, 1]} : vector<9x512xf32> to vector<1x512xf32>
    %19 = vector.broadcast %18 : vector<1x512xf32> to vector<16x512xf32>
    %20 = arith.mulf %6, %19 : vector<16x512xf32>
    %21 = arith.addf %17, %20 : vector<16x512xf32>
    %22 = vector.extract_strided_slice %2 {offsets = [2, 0], sizes = [1, 512], strides = [1, 1]} : vector<9x512xf32> to vector<1x512xf32>
    %23 = vector.broadcast %22 : vector<1x512xf32> to vector<16x512xf32>
    %24 = arith.mulf %13, %23 : vector<16x512xf32>
    %25 = arith.addf %21, %24 : vector<16x512xf32>
    %26 = vector.extract_strided_slice %1 {offsets = [0, 0], sizes = [16, 480], strides = [1, 1]} : vector<16x512xf32> to vector<16x480xf32>
    %27 = tpu.concatenate %4, %26 in 1 : vector<16x32xf32>, vector<16x480xf32> -> vector<16x512xf32>
    %28 = vector.extract_strided_slice %1 {offsets = [0, 32], sizes = [16, 480], strides = [1, 1]} : vector<16x512xf32> to vector<16x480xf32>
    %29 = tpu.concatenate %28, %4 in 1 : vector<16x480xf32>, vector<16x32xf32> -> vector<16x512xf32>
    %30 = vector.extract_strided_slice %2 {offsets = [3, 0], sizes = [1, 512], strides = [1, 1]} : vector<9x512xf32> to vector<1x512xf32>
    %31 = vector.broadcast %30 : vector<1x512xf32> to vector<16x512xf32>
    %32 = arith.mulf %27, %31 : vector<16x512xf32>
    %33 = arith.addf %25, %32 : vector<16x512xf32>
    %34 = vector.extract_strided_slice %2 {offsets = [4, 0], sizes = [1, 512], strides = [1, 1]} : vector<9x512xf32> to vector<1x512xf32>
    %35 = vector.broadcast %34 : vector<1x512xf32> to vector<16x512xf32>
    %36 = arith.mulf %1, %35 : vector<16x512xf32>
    %37 = arith.addf %33, %36 : vector<16x512xf32>
    %38 = vector.extract_strided_slice %2 {offsets = [5, 0], sizes = [1, 512], strides = [1, 1]} : vector<9x512xf32> to vector<1x512xf32>
    %39 = vector.broadcast %38 : vector<1x512xf32> to vector<16x512xf32>
    %40 = arith.mulf %29, %39 : vector<16x512xf32>
    %41 = arith.addf %37, %40 : vector<16x512xf32>
    %42 = vector.extract_strided_slice %8 {offsets = [0, 0], sizes = [16, 480], strides = [1, 1]} : vector<16x512xf32> to vector<16x480xf32>
    %43 = tpu.concatenate %4, %42 in 1 : vector<16x32xf32>, vector<16x480xf32> -> vector<16x512xf32>
    %44 = vector.extract_strided_slice %8 {offsets = [0, 32], sizes = [16, 480], strides = [1, 1]} : vector<16x512xf32> to vector<16x480xf32>
    %45 = tpu.concatenate %44, %4 in 1 : vector<16x480xf32>, vector<16x32xf32> -> vector<16x512xf32>
    %46 = vector.extract_strided_slice %2 {offsets = [6, 0], sizes = [1, 512], strides = [1, 1]} : vector<9x512xf32> to vector<1x512xf32>
    %47 = vector.broadcast %46 : vector<1x512xf32> to vector<16x512xf32>
    %48 = arith.mulf %43, %47 : vector<16x512xf32>
    %49 = arith.addf %41, %48 : vector<16x512xf32>
    %50 = vector.extract_strided_slice %2 {offsets = [7, 0], sizes = [1, 512], strides = [1, 1]} : vector<9x512xf32> to vector<1x512xf32>
    %51 = vector.broadcast %50 : vector<1x512xf32> to vector<16x512xf32>
    %52 = arith.mulf %8, %51 : vector<16x512xf32>
    %53 = arith.addf %49, %52 : vector<16x512xf32>
    %54 = vector.extract_strided_slice %2 {offsets = [8, 0], sizes = [1, 512], strides = [1, 1]} : vector<9x512xf32> to vector<1x512xf32>
    %55 = vector.broadcast %54 : vector<1x512xf32> to vector<16x512xf32>
    %56 = arith.mulf %45, %55 : vector<16x512xf32>
    %57 = arith.addf %53, %56 : vector<16x512xf32>
    %c0_6 = arith.constant 0 : index
    %c0_7 = arith.constant 0 : index
    %58 = vector.load %arg3[%c0_6, %c0_7] : memref<1x512xf32, #tpu.memory_space<vmem>>, vector<1x512xf32>
    %59 = vector.broadcast %58 : vector<1x512xf32> to vector<16x512xf32>
    %60 = arith.addf %57, %59 : vector<16x512xf32>
    %c0_8 = arith.constant 0 : index
    %c0_9 = arith.constant 0 : index
    %c0_10 = arith.constant 0 : index
    %61 = vector.load %arg4[%c0_8, %c0_9, %c0_10] : memref<1x16x512xf32, #tpu.memory_space<vmem>>, vector<1x16x512xf32>
    %62 = vector.shape_cast %61 : vector<1x16x512xf32> to vector<16x512xf32>
    %63 = vector.shape_cast %60 : vector<16x512xf32> to vector<1x16x512xf32>
    tpu.vector_store %arg4[%c0_8, %c0_9, %c0_10], %63 {strides = array<i32>} : memref<1x16x512xf32, #tpu.memory_space<vmem>>, vector<1x16x512xf32>,
    return
  }
  func.func @transform_0(%arg0: i32) -> (i32, i32, i32) {
    %c0_i32 = arith.constant 0 : i32
    %c0_i32_0 = arith.constant 0 : i32
    %c0_i32_1 = arith.constant 0 : i32
    return %arg0, %c0_i32, %c0_i32_0 : i32, i32, i32
  }
  func.func @transform_1(%arg0: i32) -> (i32, i32) {
    %c0_i32 = arith.constant 0 : i32
    %c0_i32_0 = arith.constant 0 : i32
    %c0_i32_1 = arith.constant 0 : i32
    return %c0_i32, %c0_i32_0 : i32, i32
  }
  func.func @transform_2(%arg0: i32) -> (i32, i32) {
    %c0_i32 = arith.constant 0 : i32
    %c0_i32_0 = arith.constant 0 : i32
    %c0_i32_1 = arith.constant 0 : i32
    return %c0_i32, %c0_i32_0 : i32, i32
  }
  func.func @transform_3(%arg0: i32) -> (i32, i32, i32) {
    %c0_i32 = arith.constant 0 : i32
    %c0_i32_0 = arith.constant 0 : i32
    %c0_i32_1 = arith.constant 0 : i32
    return %arg0, %c0_i32, %c0_i32_0 : i32, i32, i32
  }
}

</mosaic_0001>

<bundles_post_ra>
// kernel: tpu_custom_call.1
= control target key start
LH: loop header
LB: loop body
LE: loop exit
PB: predicated region body
PF: predicated region fallthrough
CT: control target
= control target key end

     0   :  { %8 = vsyncpa [#allocation3], 0  ;;  %s1786_s0 = inlined_call_operand.hbm [shape: f32[2,16,512], index: 0, kind: input, shape index: {}]   ;;  %s1787_s1 = inlined_call_operand.hbm [shape: f32[9,512], index: 1, kind: input, shape index: {}]   ;;  %s1788_s2 = inlined_call_operand.vmem [shape: f32[1,512], index: 2, kind: input, shape index: {}]   ;;  %s1789_s3 = inlined_call_operand.hbm [shape: f32[2,16,512], index: 3, kind: output, shape index: {}]  }
   0x1   :  { %10 = vsyncpa [#allocation3 + $0x1], 0 }
   0x2   :  { %11 = vsyncpa [#allocation6], 0 }
   0x3   :  { %12 = vsyncpa [#allocation4], 0 }
   0x4   :  { %14 = vsyncpa [#allocation4 + $0x1], 0  ;;  %s1145_s12 = smov 0   ;;  %s1147_s13 = smov 0  }
   0x5   :  { %s1149_s14 = smov 0   ;;  %s1151_s15 = smov 0  }
   0x6 LB: > { %s1166_s16 = sadd.s32 4294967295, %s1115_s15   ;;  %s903_s17 = sadd.s32 4294967294, %s1115_s15   ;;  %s1115_s15 = sphi %s1151_s15, %s1824_s15   ;;  %s1111_s14 = sphi %s1149_s14, %s1823_s14   ;;  %s1107_s13 = sphi %s1147_s13, %s1822_s13   ;;  %s1103_s12 = sphi %s1145_s12, %s1821_s12  }
   0x7   : > { %p40_p0 = scmp.ne.s32.totalorder %s1107_s13, %s1103_s12  ;;  %p1790_p1 = scmp.eq.s32.totalorder %s1166_s16, 0 }
   0x8   : > { %p112_p3 = scmp.eq.s32.totalorder %s903_s17, 1  ;;  %p904_p5 = scmp.ge.s32.totalorder %s1115_s15, 1 }
   0x9   : > { %p1175_p4 = por %p1790_p1, %p40_p0  ;;  %p119_p7 = scmp.lt.s32.totalorder %s1115_s15, 3 }
   0xa   : > { %p1180_p6 = por %p112_p3, %p40_p0  ;;  %s1117_s21 = smov [#allocation5]  }
   0xb   : > { %s1798_s18 = scalar_select %p1175_p4, 1, 0 }
   0xc   : > { %s1799_s19 = scalar_select %p1180_p6, 1, 0 }
   0xd   : > { %p1185_p8 = pnand %p904_p5, %p119_p7  ;;  %s131_s22 = sshll.u32 %s1117_s21, 4  ;;  %s1189_s22 = int_to_ptr.vmem [resolvable:$true] %s131_s22 }
   0xe   : > { %s1201_s24 = sadd.s32 1, %s1115_s15   ;;  %s27_s25 = sadd.s32 1, %s1111_s14 }
   0xf   : > { %s1800_s20 = scalar_select %p1185_p8, 1, 0 }
  0x10   : > { %p933_p9 = pneg %p1185_p8  ;;  %s24_s26 = ssub.s32 %s1115_s15, %s1201_s24 }
  0x11   : > { %s987_s29 = scalar_lea.hbm %s1787_s1, 1024 }
  0x12   : > { %p1196_p11 = pnand %p933_p9, %p1790_p1  ;;  %p988_p12 = scmp.ne.s32.totalorder %s1787_s1, %s987_s29 }
  0x13   : > { %p994_p5 = scmp.lt.u32.totalorder %s987_s29, %s1787_s1 }
  0x14   : > { %p989_p13 = pneg %p1196_p11 }
  0x16   : > { %p990_p0 = pnand %p989_p13, %p988_p12 }
  0x18   : > { %p991_p3 = pneg %p990_p0 }
  0x1a   : > { %p996_p7 = pnand %p994_p5, %p991_p3 }
  0x1c   : > { %999 = shalt.err (!%p996_p7)
}
  0x1d   : > { %s1000_s7 = scalar_lea.vmem %s1189_s22, 1024  ;;  %p1008_p2 = scmp.lt.s32.totalorder %s1189_s22, %s1189_s22 }
  0x1e   : > { %p1001_p9 = scmp.ne.s32.totalorder %s1189_s22, %s1000_s7  ;;  %p1009_p6 = scmp.lt.s32.totalorder %s1000_s7, %s1000_s7 }
  0x20   : > { %p1003_p10 = pnand %p1001_p9, %p989_p13  ;;  %p1010_p4 = por %p1009_p6, %p1008_p2 }
  0x22   : > { %p1004_p1 = pneg %p1003_p10 }
  0x24   : > { %p1011_p8 = pnand %p1010_p4, %p1004_p1 }
  0x26   : > { %1014 = shalt.err (!%p1011_p8)
}
  0x27   : > { %s1118_s8 = smov 512   ;;  %s1119_s9 = smov 32  }
  0x28   : > { %936 = dma.hbm_to_vmem [thread:$0]  (!%p1196_p11), %s1787_s1, 1024, %s1189_s22, [#allocation6], %s1118_s8, %s1118_s8, %s1119_s9  }
  0x29   : > { %p25_p1 = scmp.eq.s32.totalorder %s24_s26, 0  ;;  %p34_p2 = scmp.ne.s32.totalorder %s1111_s14, %s1107_s13 }
  0x2a   : > { %p35_p4 = scmp.eq.s32.totalorder %s1115_s15, 0  ;;  %p946_p6 = scmp.lt.s32.totalorder %s1115_s15, 2 }
  0x2b   : > { %s1235_s17 = scalar_select %p25_p1, %s1111_s14, %s27_s25  }
  0x2c   : > { %p36_p8 = por %p35_p4, %p34_p2  ;;  %p1802_p10 = scmp.eq.s32.totalorder %s1166_s16, 1 }
  0x2d   : > { %s148_s23 = sand.u32 1, %s1111_s14   ;;  %s923_s27 = sshll.u32 %s1115_s15, 10 }
  0x2e   : > { %p1239_p12 = por %p1802_p10, %p34_p2  ;;  %s907_s28 = sshll.u32 %s148_s23, 6 }
  0x2f   : > { %s1248_s4 = scalar_lea.hbm %s1786_s0, %s923_s27  ;;  %s152_s22 = scalar_lea.vmem [#allocation2], %s907_s28 }
  0x30   : > { %s159_s25 = sshll.u32 %s152_s22, 4  ;;  %p1250_p11 = pnand %p946_p6, %p36_p8  ;;  %s1254_s25 = int_to_ptr.vmem [resolvable:$true] %s159_s25 }
  0x31   : > { %s1256_s5 = scalar_lea.sflag [#allocation3], %s148_s23  ;;  %s1015_s6 = scalar_lea.hbm %s1248_s4, 1024 }
  0x32   : > { %p1016_p13 = scmp.ne.s32.totalorder %s1248_s4, %s1015_s6  ;;  %p1017_p0 = pneg %p1250_p11 }
  0x33   : > { %s1020_s11 = scalar_lea.hbm %s1786_s0, 2048  ;;  %p1021_p7 = scmp.lt.u32.totalorder %s1248_s4, %s1786_s0 }
  0x34   : > { %p1018_p3 = pnand %p1017_p0, %p1016_p13  ;;  %p1022_p9 = scmp.lt.u32.totalorder %s1020_s11, %s1015_s6 }
  0x35   : > { %p1024_p2 = scmp.lt.u32.totalorder %s1015_s6, %s1248_s4 }
  0x36   : > { %p1019_p5 = pneg %p1018_p3  ;;  %p1023_p1 = por %p1022_p9, %p1021_p7 }
  0x38   : > { %p1025_p4 = por %p1024_p2, %p1023_p1 }
  0x3a   : > { %p1026_p6 = pnand %p1025_p4, %p1019_p5 }
  0x3c   : > { %1029 = shalt.err (!%p1026_p6)
}
  0x3d   : > { %s1030_s23 = scalar_lea.vmem %s1254_s25, 1024  ;;  %s1120_s29 = smov [#allocation2]  }
  0x3e   : > { %p1031_p8 = scmp.ne.s32.totalorder %s1254_s25, %s1030_s23  ;;  %s1035_s30 = sshll.u32 %s1120_s29, 4  ;;  %s1036_s30 = int_to_ptr.vmem [resolvable:$false] %s1035_s30 }
  0x3f   : > { %s1037_s22 = scalar_lea.vmem %s1036_s30, 2048  ;;  %p1038_p3 = scmp.lt.s32.totalorder %s1254_s25, %s1036_s30 }
  0x40   : > { %p1033_p10 = pnand %p1031_p8, %p1017_p0  ;;  %p1039_p7 = scmp.lt.s32.totalorder %s1037_s22, %s1030_s23 }
  0x42   : > { %p1034_p13 = pneg %p1033_p10  ;;  %p1040_p9 = por %p1039_p7, %p1038_p3 }
  0x44   : > { %p1041_p1 = pnand %p1040_p9, %p1034_p13 }
  0x46   : > { %1044 = shalt.err (!%p1041_p1)
}
  0x47   : > { %940 = dma.hbm_to_vmem [thread:$0]  (!%p1250_p11), %s1248_s4, 1024, %s1254_s25, %s1256_s5, %s1118_s8, %s1118_s8, %s1119_s9  }
  0x48   : > { %p1805_p0 = scmp.ne.s32.totalorder %s1800_s20, 0 }
  0x4a   : > { %171 = sbr.rel (%p1805_p0) target bundleno = 322 (0x142), region = 32 }
  0x51   : > { %s1290_s6 = sand.u32 1, %s1107_s13   ;;  %p1806_p5 = scmp.ne.s32.totalorder %s1798_s18, 0 }
  0x52   : > { %s911_s7 = sshll.u32 %s1290_s6, 6  ;;  %s174_s10 = scalar_lea.sflag [#allocation3], %s1290_s6 }
  0x53   : > { %s177_s26 = scalar_lea.vmem [#allocation2], %s911_s7 }
  0x54   : > { %1090 = dma.done.wait (%p1806_p5), %s174_s10, 1024  }
  0x55   : > { %1092 = vsyncadd (%p1806_p5), %s174_s10, 4294966272  ;;  %p1807_p11 = scmp.eq.s32.totalorder %s1166_s16, 0 }
  0x57   : > { %1094 = dma.done.wait (%p1807_p11), [#allocation6], 1024   ;;  %p1808_p2 = pmov %p1807_p11 }
  0x58   : > { %v1304_v0 = vld [vmem:[%s177_s26 + $0x10] sm:$0xff]  ;;  %vm228_vm0 = vcmask 1040384   ;;  %v1306_v1 = vld [vmem:[%s177_s26] sm:$0xff]  ;;  %v1310_v4 = vld [vmem:[%s177_s26 + $0x18] sm:$0xff]  ;;  %s1121_s18 = smov 32   ;;  %s1122_s20 = smov 96   ;;  %v348_v40 = vlaneseq }
  0x59   : > { %1096 = vsyncadd (%p1808_p2), [#allocation6], 4294966272  ;;  %v231_v2 = vrot.slane %v1304_v0, 7  ;;  %v229_v3 = vrot.slane %v1306_v1, 7  ;;  %v232_v5 = vrot.slane %v1310_v4, 7  ;;  %v1313_v6 = vld [vmem:[%s177_s26 + $0x8] sm:$0xff] }
  0x5a   : > { %v1315_v7 = vld [vmem:[%s177_s26 + $0x28] sm:$0xff]  ;;  %v230_v10 = vrot.slane %v1313_v6, 7  ;;  %v1324_v11 = vld [vmem:[%s177_s26 + $0x20] sm:$0xff]  ;;  %v1338_v16 = vld [vmem:[%s177_s26 + $0x38] sm:$0xff]  ;;  %v257_v24 = vrot.slane %v1313_v6, 1  ;;  %vm253_vm1 = vcmask 1046528  }
  0x5b   : > { %v1318_v8 = vsel %vm228_vm0, 0.0, %v231_v2  ;;  %v1321_v9 = vsel %vm228_vm0, 0.0, %v229_v3  ;;  %v1331_v12 = vsel %vm228_vm0, 0.0, %v232_v5  ;;  %v235_v14 = vrot.slane %v1315_v7, 7  ;;  %v1340_v17 = vld [vmem:[%s177_s26 + $0x30] sm:$0xff]  ;;  %v1485_v43 = vld [vmem:[#allocation5] sm:$0xff] }
  0x5c   : > { %286 = vrot.lane.b32.xlu1 %v1318_v8, %s1121_s18  ;;  %282 = vrot.lane.b32.xlu0 %v1321_v9, %s1121_s18  ;;  %v1334_v13 = vsel %vm228_vm0, 0.0, %v230_v10  ;;  %v233_v15 = vrot.slane %v1324_v11, 7  ;;  %v239_v20 = vrot.slane %v1338_v16, 7  ;;  %v237_v21 = vrot.slane %v1340_v17, 7  ;;  %v1492_v46 = vld [vmem:[#allocation5 + $0x10] sm:$0xff]  ;;  %v1494_v47 = vld [vmem:[#allocation5 + $0x18] sm:$0xff] }
  0x5d   : > { %v1347_v18 = vsel %vm228_vm0, %v230_v10, %v235_v14  ;;  %v258_v25 = vrot.slane %v1315_v7, 1  ;;  %v254_v26 = vrot.slane %v1306_v1, 1  ;;  %v255_v27 = vrot.slane %v1324_v11, 1  ;;  %v1496_v48 = vld [vmem:[#allocation5 + $0x8] sm:$0xff]  ;;  %s1710_s4 = scalar_lea.vmem [#allocation7], %s911_s7  ;;  %s924_s25 = sshll.u32 %s1166_s16, 10 }
  0x5e   : > { %v1350_v19 = vsel %vm228_vm0, %v229_v3, %v233_v15  ;;  %v1359_v22 = vsel %vm228_vm0, %v232_v5, %v239_v20  ;;  %v1362_v23 = vsel %vm228_vm0, %v231_v2, %v237_v21  ;;  %v263_v29 = vrot.slane %v1310_v4, 1  ;;  %s820_s5 = sshll.u32 %s1710_s4, 4  ;;  %s1733_s28 = scalar_lea.hbm %s1789_s3, %s924_s25  ;;  %s1738_s5 = int_to_ptr.vmem [resolvable:$true] %s820_s5 }
  0x5f   : > { %v1421_v28 = vsel %vm253_vm1, %v257_v24, %v258_v25  ;;  %v1425_v30 = vsel %vm253_vm1, %v254_v26, %v255_v27  ;;  %v264_v31 = vrot.slane %v1338_v16, 1  ;;  %v260_v32 = vrot.slane %v1304_v0, 1  ;;  %s807_s16 = scalar_lea.sflag [#allocation4], %s1290_s6  ;;  %s1045_s23 = scalar_lea.vmem %s1738_s5, 1024 }
  0x60   : > { %288 = vrot.lane.b32.xlu1 %v1331_v12, %s1121_s18  ;;  %284 = vrot.lane.b32.xlu0 %v1334_v13, %s1121_s18  ;;  %v261_v33 = vrot.slane %v1340_v17, 1  ;;  %v1445_v36 = vsel %vm253_vm1, %v258_v25, 0.0  ;;  %v1448_v37 = vsel %vm253_vm1, %v255_v27, 0.0  ;;  %v1480_v41 = vshrl.u32 %v348_v40, 7  ;;  %p1046_p4 = scmp.ne.s32.totalorder %s1738_s5, %s1045_s23  ;;  %s1123_s29 = smov [#allocation7]  }
  0x61   : > { %v1435_v34 = vsel %vm253_vm1, %v263_v29, %v264_v31  ;;  %1809 = vst [vmem:[#allocation11_spill] sm:$0xff] %v1445_v36  ;;  %v1455_v38 = vsel %vm253_vm1, %v264_v31, 0.0  ;;  %vm298_vm2 = vcmask 261120   ;;  %vm331_vm3 = vcmask 785408   ;;  %s1049_s30 = sshll.u32 %s1123_s29, 4  ;;  %s1050_s30 = int_to_ptr.vmem [resolvable:$false] %s1049_s30 }
  0x62   : > { %v1438_v35 = vsel %vm253_vm1, %v260_v32, %v261_v33  ;;  %1810 = vst [vmem:[#allocation12_spill] sm:$0xff] %v1455_v38  ;;  %v1458_v39 = vsel %vm253_vm1, %v261_v33, 0.0  ;;  %v1483_v42 = vsub.s32 1, %v1480_v41  ;;  %v1488_v44 = vsub.s32 0, %v1480_v41  ;;  %p1047_p6 = pnand %p1046_p4, %p1239_p12  ;;  %s1051_s22 = scalar_lea.vmem %s1050_s30, 2048 }
  0x63   : > { %1811 = vst [vmem:[#allocation13_spill] sm:$0xff] %v1458_v39  ;;  %p1052_p10 = scmp.lt.s32.totalorder %s1738_s5, %s1050_s30  ;;  %p1053_p13 = scmp.lt.s32.totalorder %s1051_s22, %s1045_s23 }
  0x64   : > { %292 = vrot.lane.b32.xlu1 %v1347_v18, %s1121_s18  ;;  %290 = vrot.lane.b32.xlu0 %v1350_v19, %s1121_s18  ;;  %v383_v45 = vrot.slane %v1485_v43, %v1483_v42  ;;  %v351_v49 = vrot.slane %v1485_v43, %v1488_v44  ;;  %v391_v50 = vrot.slane %v1492_v46, %v1483_v42  ;;  %p1048_p8 = pneg %p1047_p6 }
  0x65   : > { %v395_v52 = vrot.slane %v1494_v47, %v1483_v42  ;;  %v387_v53 = vrot.slane %v1496_v48, %v1483_v42  ;;  %v363_v58 = vrot.slane %v1494_v47, %v1488_v44  ;;  %v355_v59 = vrot.slane %v1496_v48, %v1488_v44  ;;  %p1054_p3 = por %p1053_p13, %p1052_p10 }
  0x66   : > { %v396_v51 = vmul.f32 %v383_v45, %v1321_v9  ;;  %v359_v60 = vrot.slane %v1492_v46, %v1488_v44  ;;  %v398_v61 = vmul.f32 %v391_v50, %v1318_v8 }
  0x67   : > { %v399_v62 = vmul.f32 %v395_v52, %v1331_v12  ;;  %v397_v63 = vmul.f32 %v387_v53, %v1334_v13  ;;  %v401_v24 = vmul.f32 %v387_v53, %v1347_v18  ;;  %v403_v40 = vmul.f32 %v395_v52, %v1359_v22  ;;  %p1055_p7 = pnand %p1054_p3, %p1048_p8 }
  0x68   : > { %296 = vrot.lane.b32.xlu1 %v1359_v22, %s1121_s18  ;;  %294 = vrot.lane.b32.xlu0 %v1362_v23, %s1121_s18 }
  0x6c   : > { %317 = vrot.lane.b32.xlu1 %v1334_v13, %s1122_s20  ;;  %315 = vrot.lane.b32.xlu0 %v1321_v9, %s1122_s20 }
  0x70   : > { %321 = vrot.lane.b32.xlu1 %v1331_v12, %s1122_s20  ;;  %319 = vrot.lane.b32.xlu0 %v1318_v8, %s1122_s20  ;;  %v400_v8 = vmul.f32 %v383_v45, %v1350_v19 }
  0x74   : > { %325 = vrot.lane.b32.xlu1 %v1347_v18, %s1122_s20  ;;  %323 = vrot.lane.b32.xlu0 %v1350_v19, %s1122_s20 }
  0x78   : > { %329 = vrot.lane.b32.xlu1 %v1359_v22, %s1122_s20  ;;  %327 = vrot.lane.b32.xlu0 %v1362_v23, %s1122_s20 }
  0x7c   : > { %446 = vrot.lane.b32.xlu1 %v1313_v6, %s1121_s18  ;;  %444 = vrot.lane.b32.xlu0 %v1306_v1, %s1121_s18 }
  0x80   : > { %450 = vrot.lane.b32.xlu1 %v1310_v4, %s1121_s18  ;;  %448 = vrot.lane.b32.xlu0 %v1304_v0, %s1121_s18 }
  0x84   : > { %454 = vrot.lane.b32.xlu1 %v1315_v7, %s1121_s18  ;;  %452 = vrot.lane.b32.xlu0 %v1324_v11, %s1121_s18 }
  0x88   : > { %458 = vrot.lane.b32.xlu1 %v1338_v16, %s1121_s18  ;;  %456 = vrot.lane.b32.xlu0 %v1340_v17, %s1121_s18 }
  0x8c   : > { %478 = vrot.lane.b32.xlu1 %v1313_v6, %s1122_s20  ;;  %476 = vrot.lane.b32.xlu0 %v1306_v1, %s1122_s20 }
  0x90   : > { %482 = vrot.lane.b32.xlu1 %v1310_v4, %s1122_s20  ;;  %480 = vrot.lane.b32.xlu0 %v1304_v0, %s1122_s20 }
  0x94   : > { %486 = vrot.lane.b32.xlu1 %v1315_v7, %s1122_s20  ;;  %484 = vrot.lane.b32.xlu0 %v1324_v11, %s1122_s20 }
  0x98   : > { %490 = vrot.lane.b32.xlu1 %v1338_v16, %s1122_s20  ;;  %488 = vrot.lane.b32.xlu0 %v1340_v17, %s1122_s20 }
  0x9c   : > { %610 = vrot.lane.b32.xlu1 %v1421_v28, %s1121_s18  ;;  %608 = vrot.lane.b32.xlu0 %v1425_v30, %s1121_s18 }
  0xa0   : > { %614 = vrot.lane.b32.xlu1 %v1435_v34, %s1121_s18  ;;  %612 = vrot.lane.b32.xlu0 %v1438_v35, %s1121_s18 }
  0xa4   : > { %618 = vrot.lane.b32.xlu1 %v1445_v36, %s1121_s18  ;;  %616 = vrot.lane.b32.xlu0 %v1448_v37, %s1121_s18 }
  0xa8   : > { %622 = vrot.lane.b32.xlu1 %v1455_v38, %s1121_s18  ;;  %620 = vrot.lane.b32.xlu0 %v1458_v39, %s1121_s18 }
  0xac   : > { %642 = vrot.lane.b32.xlu1 %v1421_v28, %s1122_s20  ;;  %640 = vrot.lane.b32.xlu0 %v1425_v30, %s1122_s20 }
  0xb0   : > { %646 = vrot.lane.b32.xlu1 %v1435_v34, %s1122_s20  ;;  %644 = vrot.lane.b32.xlu0 %v1438_v35, %s1122_s20 }
  0xb4   : > { %650 = vrot.lane.b32.xlu1 %v1445_v36, %s1122_s20  ;;  %648 = vrot.lane.b32.xlu0 %v1448_v37, %s1122_s20 }
  0xb8   : > { %654 = vrot.lane.b32.xlu1 %v1455_v38, %s1122_s20  ;;  %652 = vrot.lane.b32.xlu0 %v1458_v39, %s1122_s20 }
  0xce   : > { %v287_v54 = vpop.permute.xlu1 %286  ;;  %v283_v55 = vpop.permute.xlu0 %282 }
  0xcf   : > { %v313_v56 = vsel %vm298_vm2, 0.0, %v283_v55 }
  0xd0   : > { %v364_v57 = vmul.f32 %v351_v49, %v313_v56 }
  0xd2   : > { %v1517_v2 = vadd.f32 %v396_v51, %v364_v57  ;;  %v289_v3 = vpop.permute.xlu1 %288  ;;  %v285_v5 = vpop.permute.xlu0 %284  ;;  %v402_v51 = vmul.f32 %v391_v50, %v1362_v23  ;;  %v1543_v50 = vsub.s32 2, %v1480_v41 }
  0xd3   : > { %v301_v9 = vsel %vm298_vm2, %v287_v54, %v289_v3  ;;  %v299_v10 = vsel %vm298_vm2, %v283_v55, %v285_v5  ;;  %v300_v14 = vsel %vm298_vm2, %v285_v5, %v287_v54  ;;  %v542_v3 = vsub.s32 4, %v1480_v41 }
  0xd4   : > { %v367_v15 = vmul.f32 %v363_v58, %v301_v9  ;;  %v365_v20 = vmul.f32 %v355_v59, %v299_v10  ;;  %v366_v21 = vmul.f32 %v359_v60, %v300_v14  ;;  %1812 = vst [vmem:[#allocation14_spill] sm:$0xff] %v1543_v50  ;;  %v419_v5 = vrot.slane %v1496_v48, %v1543_v50 }
  0xd5   : > { %v1552_v9 = vsub.s32 3, %v1480_v41  ;;  %v427_v10 = vrot.slane %v1494_v47, %v1543_v50  ;;  %v423_v14 = vrot.slane %v1492_v46, %v1543_v50 }
  0xd6   : > { %v1524_v12 = vadd.f32 %v399_v62, %v367_v15  ;;  %v405_v13 = vadd.f32 %v397_v63, %v365_v20  ;;  %v1526_v25 = vadd.f32 %v398_v61, %v366_v21  ;;  %v293_v26 = vpop.permute.xlu1 %292  ;;  %v291_v27 = vpop.permute.xlu0 %290 }
  0xd7   : > { %v302_v29 = vsel %vm298_vm2, %v291_v27, %v293_v26  ;;  %v314_v31 = vsel %vm298_vm2, 0.0, %v291_v27  ;;  %1813 = vst [vmem:[#allocation15_spill] sm:$0xff] %v1552_v9  ;;  %v547_v27 = vrot.slane %v1496_v48, %v542_v3 }
  0xd8   : > { %v368_v32 = vmul.f32 %v351_v49, %v314_v31  ;;  %v369_v33 = vmul.f32 %v355_v59, %v302_v29 }
  0xda   : > { %v1532_v18 = vadd.f32 %v400_v8, %v368_v32  ;;  %v1534_v19 = vadd.f32 %v401_v24, %v369_v33  ;;  %v297_v45 = vpop.permute.xlu1 %296  ;;  %v295_v53 = vpop.permute.xlu0 %294  ;;  %v511_v32 = vrot.slane %v1485_v43, %v1552_v9  ;;  %v515_v33 = vrot.slane %v1496_v48, %v1552_v9 }
  0xdb   : > { %v303_v54 = vsel %vm298_vm2, %v293_v26, %v295_v53  ;;  %v304_v55 = vsel %vm298_vm2, %v295_v53, %v297_v45  ;;  %v543_v26 = vrot.slane %v1485_v43, %v542_v3  ;;  %v555_v45 = vrot.slane %v1494_v47, %v542_v3 }
  0xdc   : > { %v370_v56 = vmul.f32 %v359_v60, %v303_v54  ;;  %v371_v57 = vmul.f32 %v363_v58, %v304_v55  ;;  %v415_v60 = vrot.slane %v1485_v43, %v1543_v50  ;;  %v551_v53 = vrot.slane %v1492_v46, %v542_v3 }
  0xde   : > { %v1538_v61 = vadd.f32 %v402_v51, %v370_v56  ;;  %v1540_v49 = vadd.f32 %v403_v40, %v371_v57  ;;  %v318_v59 = vpop.permute.xlu1 %317  ;;  %v316_v22 = vpop.permute.xlu0 %315  ;;  %v519_v56 = vrot.slane %v1492_v46, %v1552_v9  ;;  %v523_v57 = vrot.slane %v1494_v47, %v1552_v9 }
  0xdf   : > { %v332_v58 = vsel %vm331_vm3, %v316_v22, %v318_v59  ;;  %v557_v22 = vmul.f32 %v547_v27, %v1313_v6  ;;  %v558_v6 = vmul.f32 %v551_v53, %v1304_v0  ;;  %v560_v0 = vmul.f32 %v543_v26, %v1324_v11 }
  0xe0   : > { %v428_v29 = vmul.f32 %v415_v60, %v332_v58 }
  0xe2   : > { %v322_v52 = vpop.permute.xlu1 %321  ;;  %v320_v23 = vpop.permute.xlu0 %319 }
  0xe3   : > { %v333_v15 = vsel %vm331_vm3, %v318_v59, %v320_v23  ;;  %v346_v20 = vsel %vm331_vm3, %v322_v52, 0.0  ;;  %v334_v21 = vsel %vm331_vm3, %v320_v23, %v322_v52  ;;  %v556_v59 = vmul.f32 %v543_v26, %v1306_v1 }
  0xe4   : > { %v429_v31 = vmul.f32 %v419_v5, %v333_v15  ;;  %v431_v40 = vmul.f32 %v427_v10, %v346_v20  ;;  %v430_v51 = vmul.f32 %v423_v14, %v334_v21  ;;  %v436_v52 = vadd.f32 %v428_v29, %v1517_v2 }
  0xe5   : > { %v559_v1 = vmul.f32 %v555_v45, %v1310_v4 }
  0xe6   : > { %v326_v62 = vpop.permute.xlu1 %325  ;;  %v324_v63 = vpop.permute.xlu0 %323  ;;  %v437_v15 = vadd.f32 %v429_v31, %v405_v13  ;;  %v439_v38 = vadd.f32 %v431_v40, %v1524_v12  ;;  %v438_v36 = vadd.f32 %v430_v51, %v1526_v25 }
  0xe7   : > { %v335_v23 = vsel %vm331_vm3, %v324_v63, %v326_v62 }
  0xe8   : > { %v432_v2 = vmul.f32 %v415_v60, %v335_v23  ;;  %v561_v60 = vmul.f32 %v547_v27, %v1315_v7 }
  0xea   : > { %v330_v24 = vpop.permute.xlu1 %329  ;;  %v328_v8 = vpop.permute.xlu0 %327 }
  0xeb   : > { %v336_v20 = vsel %vm331_vm3, %v326_v62, %v328_v8  ;;  %v347_v63 = vsel %vm331_vm3, %v330_v24, 0.0  ;;  %v337_v13 = vsel %vm331_vm3, %v328_v8, %v330_v24 }
  0xec   : > { %v433_v62 = vmul.f32 %v419_v5, %v336_v20 }
  0xee   : > { %v447_v54 = vpop.permute.xlu1 %446  ;;  %v445_v55 = vpop.permute.xlu0 %444 }
  0xef   : > { %v460_v58 = vsel %vm298_vm2, %v445_v55, %v447_v54  ;;  %v474_v3 = vsel %vm298_vm2, 0.0, %v445_v55 }
  0xf0   : > { %v524_v21 = vmul.f32 %v511_v32, %v474_v3  ;;  %v525_v39 = vmul.f32 %v515_v33, %v460_v58 }
  0xf2   : > { %v532_v29 = vadd.f32 %v524_v21, %v436_v52  ;;  %v533_v9 = vadd.f32 %v525_v39, %v437_v15  ;;  %v451_v50 = vpop.permute.xlu1 %450  ;;  %v449_v55 = vpop.permute.xlu0 %448  ;;  %v440_v39 = vadd.f32 %v432_v2, %v1532_v18  ;;  %v435_v52 = vmul.f32 %v427_v10, %v347_v63 }
  0xf3   : > { %v461_v31 = vsel %vm298_vm2, %v447_v54, %v449_v55  ;;  %v462_v12 = vsel %vm298_vm2, %v449_v55, %v451_v50  ;;  %v434_v54 = vmul.f32 %v423_v14, %v337_v13  ;;  %v441_v50 = vadd.f32 %v433_v62, %v1534_v19 }
  0xf4   : > { %v526_v40 = vmul.f32 %v519_v56, %v461_v31  ;;  %v527_v25 = vmul.f32 %v523_v57, %v462_v12  ;;  %v1588_v51 = vadd.f32 %v556_v59, %v532_v29  ;;  %v1590_v4 = vadd.f32 %v557_v22, %v533_v9 }
  0xf5   : > { %v562_v14 = vmul.f32 %v551_v53, %v1340_v17  ;;  %v443_v19 = vadd.f32 %v435_v52, %v1540_v49  ;;  %v442_v26 = vadd.f32 %v434_v54, %v1538_v61  ;;  %v706_v29 = vsub.s32 7, %v1480_v41 }
  0xf6   : > { %v534_v23 = vadd.f32 %v526_v40, %v438_v36  ;;  %v535_v24 = vadd.f32 %v527_v25, %v439_v38  ;;  %v455_v5 = vpop.permute.xlu1 %454  ;;  %v453_v8 = vpop.permute.xlu0 %452  ;;  %v563_v38 = vmul.f32 %v555_v45, %v1338_v16  ;;  %v574_v62 = vsub.s32 5, %v1480_v41 }
  0xf7   : > { %v463_v58 = vsel %vm298_vm2, %v453_v8, %v455_v5  ;;  %v475_v59 = vsel %vm298_vm2, 0.0, %v453_v8  ;;  %v1618_v55 = vrot.slane %v1496_v48, %v706_v29  ;;  %v707_v13 = vrot.slane %v1485_v43, %v706_v29 }
  0xf8   : > { %v528_v9 = vmul.f32 %v511_v32, %v475_v59  ;;  %v529_v22 = vmul.f32 %v515_v33, %v463_v58  ;;  %v1598_v3 = vadd.f32 %v559_v1, %v535_v24  ;;  %v1600_v11 = vadd.f32 %v558_v6, %v534_v23 }
  0xf9   : > { %v1623_v40 = vrot.slane %v1494_v47, %v706_v29  ;;  %v674_v25 = vsub.s32 6, %v1480_v41  ;;  %v575_v52 = vrot.slane %v1485_v43, %v574_v62  ;;  %v587_v8 = vrot.slane %v1494_v47, %v574_v62 }
  0xfa   : > { %v536_v7 = vadd.f32 %v528_v9, %v440_v39  ;;  %v537_v18 = vadd.f32 %v529_v22, %v441_v50  ;;  %v459_v10 = vpop.permute.xlu1 %458  ;;  %v457_v36 = vpop.permute.xlu0 %456  ;;  %v1634_v39 = vrot.slane %v1492_v46, %v706_v29  ;;  %v583_v54 = vrot.slane %v1492_v46, %v574_v62 }
  0xfb   : > { %v464_v27 = vsel %vm298_vm2, %v455_v5, %v457_v36  ;;  %v465_v32 = vsel %vm298_vm2, %v457_v36, %v459_v10  ;;  %v1639_v5 = vmul.f32 %v1623_v40, %v1435_v34  ;;  %v675_v58 = vrot.slane %v1485_v43, %v674_v25  ;;  %v768_v43 = vld [vmem:[%s1788_s2] sm:$0xf] }
  0xfc   : > { %v530_v33 = vmul.f32 %v519_v56, %v464_v27  ;;  %v531_v15 = vmul.f32 %v523_v57, %v465_v32  ;;  %v1608_v20 = vadd.f32 %v560_v0, %v536_v7  ;;  %v1610_v21 = vadd.f32 %v561_v60, %v537_v18 }
  0xfd   : > { %v1628_v0 = vmul.f32 %v1618_v55, %v1421_v28  ;;  %v1631_v60 = vmul.f32 %v707_v13, %v1425_v30  ;;  %v579_v28 = vrot.slane %v1496_v48, %v574_v62  ;;  %v679_v9 = vrot.slane %v1496_v48, %v674_v25 }
  0xfe   : > { %v538_v1 = vadd.f32 %v530_v33, %v442_v26  ;;  %v539_v6 = vadd.f32 %v531_v15, %v443_v19  ;;  %v479_v2 = vpop.permute.xlu1 %478  ;;  %v477_v16 = vpop.permute.xlu0 %476  ;;  %v687_v22 = vrot.slane %v1494_v47, %v674_v25  ;;  %v1654_v10 = vrot.slane %v1492_v46, %v674_v25 }
  0xff   : > { %v492_v41 = vsel %vm331_vm3, %v477_v16, %v479_v2  ;;  %v1661_v48 = vmul.f32 %v707_v13, %v1448_v37  ;;  %v722_v27 = vmul.f32 %v1634_v39, %v1438_v35  ;;  %v1675_v35 = vrot.slane %v768_v43, %v1483_v42 }
 0x100   : > { %v1612_v45 = vadd.f32 %v563_v38, %v539_v6  ;;  %v1614_v17 = vadd.f32 %v562_v14, %v538_v1  ;;  %v588_v7 = vmul.f32 %v575_v52, %v492_v41  ;;  %v914_v41 = vld [vmem:[#allocation5 + $0x20] ss:$0 sm:$0xff] }
 0x102   : > { %v483_v49 = vpop.permute.xlu1 %482  ;;  %v481_v61 = vpop.permute.xlu0 %480  ;;  %v596_v37 = vadd.f32 %v588_v7, %v1588_v51 }
 0x103   : > { %v506_v30 = vsel %vm331_vm3, %v483_v49, 0.0  ;;  %v493_v50 = vsel %vm331_vm3, %v479_v2, %v481_v61  ;;  %v494_v59 = vsel %vm331_vm3, %v481_v61, %v483_v49  ;;  %v1669_v2 = vrot.slane %v768_v43, %v1488_v44 }
 0x104   : > { %v591_v19 = vmul.f32 %v587_v8, %v506_v30  ;;  %v589_v26 = vmul.f32 %v579_v28, %v493_v50  ;;  %v590_v46 = vmul.f32 %v583_v54, %v494_v59  ;;  %v1814_v30 = vld [vmem:[#allocation14_spill] sm:$0xff] }
 0x105   : > { %v1683_v42 = vrot.slane %v768_v43, %v1814_v30 }
 0x106   : > { %v487_v53 = vpop.permute.xlu1 %486  ;;  %v485_v63 = vpop.permute.xlu0 %484  ;;  %v597_v13 = vadd.f32 %v589_v26, %v1590_v4  ;;  %v598_v44 = vadd.f32 %v590_v46, %v1600_v11  ;;  %v915_v26 = vld [vmem:[#allocation5 + $0x28] ss:$0 sm:$0xff] }
 0x107   : > { %v495_v32 = vsel %vm331_vm3, %v485_v63, %v487_v53  ;;  %v599_v63 = vadd.f32 %v591_v19, %v1598_v3 }
 0x108   : > { %v592_v62 = vmul.f32 %v575_v52, %v495_v32 }
 0x10a   : > { %v491_v56 = vpop.permute.xlu1 %490  ;;  %v489_v57 = vpop.permute.xlu0 %488  ;;  %v600_v11 = vadd.f32 %v592_v62, %v1608_v20 }
 0x10b   : > { %v507_v15 = vsel %vm331_vm3, %v491_v56, 0.0  ;;  %v496_v16 = vsel %vm331_vm3, %v487_v53, %v489_v57  ;;  %v497_v51 = vsel %vm331_vm3, %v489_v57, %v491_v56 }
 0x10c   : > { %v593_v25 = vmul.f32 %v579_v28, %v496_v16  ;;  %v594_v56 = vmul.f32 %v583_v54, %v497_v51  ;;  %v917_v54 = vld [vmem:[#allocation5 + $0x38] ss:$0 sm:$0xff]  ;;  %v1816_v16 = vld [vmem:[#allocation11_spill] sm:$0xff] }
 0x10e   : > { %v611_v31 = vpop.permute.xlu1 %610  ;;  %v609_v12 = vpop.permute.xlu0 %608 }
 0x10f   : > { %v638_v34 = vsel %vm298_vm2, 0.0, %v609_v12  ;;  %v624_v18 = vsel %vm298_vm2, %v609_v12, %v611_v31  ;;  %v595_v12 = vmul.f32 %v587_v8, %v507_v15 }
 0x110   : > { %v688_v33 = vmul.f32 %v675_v58, %v638_v34  ;;  %v689_v1 = vmul.f32 %v679_v9, %v624_v18  ;;  %v1815_v34 = vld [vmem:[#allocation15_spill] sm:$0xff] }
 0x111   : > { %v1687_v7 = vrot.slane %v768_v43, %v1815_v34  ;;  %v603_v28 = vadd.f32 %v595_v12, %v1612_v45 }
 0x112   : > { %v615_v23 = vpop.permute.xlu1 %614  ;;  %v613_v24 = vpop.permute.xlu0 %612  ;;  %v696_v53 = vadd.f32 %v688_v33, %v596_v37 }
 0x113   : > { %v626_v36 = vsel %vm298_vm2, %v613_v24, %v615_v23  ;;  %v625_v47 = vsel %vm298_vm2, %v611_v31, %v613_v24  ;;  %v697_v23 = vadd.f32 %v689_v1, %v597_v13 }
 0x114   : > { %v691_v6 = vmul.f32 %v687_v22, %v626_v36  ;;  %v690_v49 = vmul.f32 %v1654_v10, %v625_v47  ;;  %v728_v36 = vadd.f32 %v1631_v60, %v696_v53  ;;  %v916_v47 = vld [vmem:[#allocation5 + $0x30] ss:$0 sm:$0xff] }
 0x115   : > { %v729_v20 = vadd.f32 %v1628_v0, %v697_v23 }
 0x116   : > { %v619_v38 = vpop.permute.xlu1 %618  ;;  %v617_v14 = vpop.permute.xlu0 %616  ;;  %v699_v24 = vadd.f32 %v691_v6, %v599_v63  ;;  %v698_v50 = vadd.f32 %v690_v49, %v598_v44  ;;  %v1817_v49 = vld [vmem:[#allocation12_spill] sm:$0xff]  ;;  %v1818_v44 = vld [vmem:[#allocation13_spill] sm:$0xff] }
 0x117   : > { %v639_v31 = vsel %vm298_vm2, 0.0, %v617_v14  ;;  %v627_v3 = vsel %vm298_vm2, %v617_v14, %v619_v38 }
 0x118   : > { %v692_v4 = vmul.f32 %v675_v58, %v639_v31  ;;  %v601_v58 = vadd.f32 %v593_v25, %v1610_v21  ;;  %v731_v19 = vadd.f32 %v1639_v5, %v699_v24  ;;  %v693_v43 = vmul.f32 %v679_v9, %v627_v3 }
 0x119   : > { %v730_v45 = vadd.f32 %v722_v27, %v698_v50  ;;  %v727_v27 = vmul.f32 %v1623_v40, %v1817_v49  ;;  %v726_v40 = vmul.f32 %v1634_v39, %v1818_v44 }
 0x11a   : > { %v623_v61 = vpop.permute.xlu1 %622  ;;  %v621_v29 = vpop.permute.xlu0 %620  ;;  %v700_v46 = vadd.f32 %v692_v4, %v600_v11 }
 0x11b   : > { %v629_v57 = vsel %vm298_vm2, %v621_v29, %v623_v61  ;;  %v628_v18 = vsel %vm298_vm2, %v619_v38, %v621_v29  ;;  %v602_v61 = vadd.f32 %v594_v56, %v1614_v17 }
 0x11c   : > { %v695_v32 = vmul.f32 %v687_v22, %v629_v57  ;;  %v694_v60 = vmul.f32 %v1654_v10, %v628_v18  ;;  %v725_v22 = vmul.f32 %v1618_v55, %v1816_v16  ;;  %v701_v10 = vadd.f32 %v693_v43, %v601_v58 }
 0x11d   : > { %v732_v51 = vadd.f32 %v1661_v48, %v700_v46 }
 0x11e   : > { %v643_v52 = vpop.permute.xlu1 %642  ;;  %v641_v59 = vpop.permute.xlu0 %640  ;;  %v703_v29 = vadd.f32 %v695_v32, %v603_v28  ;;  %v702_v12 = vadd.f32 %v694_v60, %v602_v61  ;;  %v733_v3 = vadd.f32 %v725_v22, %v701_v10 }
 0x11f   : > { %v656_v8 = vsel %vm331_vm3, %v641_v59, %v643_v52 }
 0x120   : > { %v752_v14 = vmul.f32 %v914_v41, %v656_v8  ;;  %v735_v39 = vadd.f32 %v727_v27, %v703_v29 }
 0x122   : > { %v760_v33 = vadd.f32 %v752_v14, %v728_v36  ;;  %v647_v15 = vpop.permute.xlu1 %646  ;;  %v645_v38 = vpop.permute.xlu0 %644 }
 0x123   : > { %v670_v1 = vsel %vm331_vm3, %v647_v15, 0.0  ;;  %v657_v21 = vsel %vm331_vm3, %v643_v52, %v645_v38  ;;  %v658_v5 = vsel %vm331_vm3, %v645_v38, %v647_v15  ;;  %v734_v52 = vadd.f32 %v726_v40, %v702_v12 }
 0x124   : > { %v790_v9 = vadd.f32 %v1669_v2, %v760_v33  ;;  %v753_v6 = vmul.f32 %v915_v26, %v657_v21  ;;  %v754_v0 = vmul.f32 %v916_v47, %v658_v5  ;;  %v755_v37 = vmul.f32 %v917_v54, %v670_v1 }
 0x126   : > { %798 = vst [vmem:[%s1710_s4] sm:$0xff] %v790_v9  ;;  %v761_v63 = vadd.f32 %v753_v6, %v729_v20  ;;  %v762_v13 = vadd.f32 %v754_v0, %v730_v45  ;;  %v651_v62 = vpop.permute.xlu1 %650  ;;  %v649_v31 = vpop.permute.xlu0 %648  ;;  %v763_v55 = vadd.f32 %v755_v37, %v731_v19 }
 0x127   : > { %v659_v17 = vsel %vm331_vm3, %v649_v31, %v651_v62 }
 0x128   : > { %v791_v53 = vadd.f32 %v1675_v35, %v761_v63  ;;  %v792_v25 = vadd.f32 %v1683_v42, %v762_v13  ;;  %v756_v23 = vmul.f32 %v914_v41, %v659_v17  ;;  %v793_v24 = vadd.f32 %v1687_v7, %v763_v55 }
 0x12a   : > { %799 = vst [vmem:[%s1710_s4 + $0x8] sm:$0xff] %v791_v53  ;;  %800 = vst [vmem:[%s1710_s4 + $0x10] sm:$0xff] %v792_v25  ;;  %v764_v30 = vadd.f32 %v756_v23, %v732_v51  ;;  %v655_v50 = vpop.permute.xlu1 %654  ;;  %v653_v4 = vpop.permute.xlu0 %652 }
 0x12b   : > { %801 = vst [vmem:[%s1710_s4 + $0x18] sm:$0xff] %v793_v24  ;;  %v671_v48 = vsel %vm331_vm3, %v655_v50, 0.0  ;;  %v660_v59 = vsel %vm331_vm3, %v651_v62, %v653_v4  ;;  %v661_v41 = vsel %vm331_vm3, %v653_v4, %v655_v50 }
 0x12c   : > { %v794_v34 = vadd.f32 %v1669_v2, %v764_v30  ;;  %v759_v11 = vmul.f32 %v917_v54, %v671_v48  ;;  %v757_v56 = vmul.f32 %v915_v26, %v660_v59  ;;  %v758_v57 = vmul.f32 %v916_v47, %v661_v41 }
 0x12e   : > { %802 = vst [vmem:[%s1710_s4 + $0x20] sm:$0xff] %v794_v34  ;;  %v767_v8 = vadd.f32 %v759_v11, %v735_v39  ;;  %v765_v28 = vadd.f32 %v757_v56, %v733_v3  ;;  %v766_v18 = vadd.f32 %v758_v57, %v734_v52 }
 0x130   : > { %v797_v2 = vadd.f32 %v1687_v7, %v767_v8  ;;  %v795_v36 = vadd.f32 %v1675_v35, %v765_v28  ;;  %v796_v14 = vadd.f32 %v1683_v42, %v766_v18 }
 0x132   : > { %805 = vst [vmem:[%s1710_s4 + $0x38] sm:$0xff] %v797_v2  ;;  %803 = vst [vmem:[%s1710_s4 + $0x28] sm:$0xff] %v795_v36 }
 0x133   : > { %804 = vst [vmem:[%s1710_s4 + $0x30] sm:$0xff] %v796_v14 }
 0x134   : > { %1058 = shalt.err (!%p1055_p7)
}
 0x135   : > { %s1059_s7 = scalar_lea.hbm %s1733_s28, 1024  ;;  %s1063_s20 = scalar_lea.hbm %s1789_s3, 2048 }
 0x136   : > { %p1060_p9 = scmp.ne.s32.totalorder %s1733_s28, %s1059_s7  ;;  %p1064_p5 = scmp.lt.u32.totalorder %s1733_s28, %s1789_s3 }
 0x137   : > { %p1065_p11 = scmp.lt.u32.totalorder %s1063_s20, %s1059_s7  ;;  %p1067_p4 = scmp.lt.u32.totalorder %s1059_s7, %s1733_s28 }
 0x138   : > { %p1061_p1 = pnand %p1060_p9, %p1239_p12 }
 0x139   : > { %p1066_p2 = por %p1065_p11, %p1064_p5 }
 0x13a   : > { %p1062_p0 = pneg %p1061_p1 }
 0x13b   : > { %p1068_p6 = por %p1067_p4, %p1066_p2 }
 0x13d   : > { %p1069_p8 = pnand %p1068_p6, %p1062_p0 }
 0x13f   : > { %1072 = shalt.err (!%p1069_p8)
}
 0x140   : > { %s1124_s4 = smov 512  }
 0x141   : > { %931 = dma.vmem_to_hbm [thread:$0]  (%p1239_p12), %s1738_s5, 1024, %s1733_s28, %s807_s16, %s1124_s4, %s1124_s4, %s1121_s18  }
 0x142 PF: > { %s835_s25 = sand.u32 1, %s1103_s12   ;;  %p1819_p10 = scmp.ne.s32.totalorder %s1799_s19, 0 }
 0x143   : > { %p1820_p13 = scmp.ge.s32.totalorder %s1115_s15, 2  ;;  %s836_s11 = scalar_lea.sflag [#allocation4], %s835_s25 }
 0x145   : > { %p942_p3 = pnand %p1820_p13, %p1819_p10 }
 0x147   : > { %1098 = dma.done.wait (!%p942_p3), %s836_s11, 1024  }
 0x148   : > { %1100 = vsyncadd (!%p942_p3), %s836_s11, 4294966272  ;;  %p17_p7 = scmp.ge.s32.totalorder %s1201_s24, 4   ;;  %s1821_s12 = smov %s1107_s13 }
 0x149   : > { %s1822_s13 = smov %s1111_s14  ;;  %s1823_s14 = smov %s1235_s17 }
 0x14a   : > { %s1824_s15 = smov %s1201_s24  ;;  %19 = sbr.rel (!%p17_p7) target bundleno = 6 (0x6), region = 81 }
 0x151   :  { %841 = vsyncpa [#allocation3], 1 }
 0x152   :  { %843 = vsyncpa [#allocation3 + $0x1], 1 }
 0x153   :  { %844 = vsyncpa [#allocation6], 1 }
 0x154   :  { %845 = vsyncpa [#allocation4], 1 }
 0x155   :  { %847 = vsyncpa [#allocation4 + $0x1], 1 }

</bundles_post_ra>
